<compile_context>
chip_gen: v7x
topology: tpu7x:2x2x1
jax: 0.10.0
libtpu: 0.0.40
codegen_flags: <defaults>
</compile_context>

<pallas_src>
import functools
import math

import jax
import jax.numpy as jnp
from jax.experimental import pallas as pl
from jax.experimental.pallas import tpu as pltpu


# ----------------------------- VMEM budgeting -------------------------------


def _device_vmem_limit_bytes():
    """Per-generation compiler VMEM limit: ~0.75x capacity on 128 MiB parts
    (v5e/v6e -> ~96 MiB), capped to ~40 MiB on the 64 MiB v7x part."""
    try:
        cap = int(pltpu.get_tpu_info().vmem_capacity_bytes)
    except Exception:  # not queryable -> assume the smallest part (v7x, 64 MiB)
        cap = 64 * 1024 * 1024
    return max(16 * 1024 * 1024, min(int(0.75 * cap), cap - 24 * 1024 * 1024))


def _fused_step_bytes(rb, hw, itemsize):
    """Per-grid-step VMEM footprint of the fused kernel (conservative)."""
    io = 2 * 2 * rb * hw * itemsize      # x in + y out, double-buffered
    temps = 3 * rb * hw * 4              # x_f32, centered x, y_f32
    p = 2 * rb * rb * 4                  # resident same-group indicator matrix
    vecs = 24 * rb * 4                   # gamma/beta buffers + small stat vectors
    return io + temps + p + vecs


def _chunked_step_bytes(c, hw, itemsize):
    """Per-grid-step VMEM footprint of the chunked stats/apply kernels."""
    io = 2 * 2 * c * hw * itemsize
    temps = 2 * c * hw * 4
    p = 2 * c * c * 4
    vecs = 48 * c * 4
    return io + temps + p + vecs


def _pick_nb(N, C, HW, itemsize, budget, target_bytes=2 << 20, rb_cap=1024):
    """Samples packed per fused grid step, or None if the fused path is
    infeasible under `budget`.

    Row-block heights must be multiples of 8 (sublane rule) or the full N*C
    extent; rows are packed in whole samples so group statistics never mix
    across block boundaries (OOB tail rows only corrupt discarded rows)."""
    nb_step = 8 // math.gcd(8, C)
    cands = sorted(set(list(range(nb_step, N + 1, nb_step)) + [N]))
    nb_min = cands[0]
    feas = [nb for nb in cands
            if _fused_step_bytes(nb * C, HW, itemsize) <= budget
            and (nb * C <= rb_cap or nb == nb_min)]
    if not feas:
        return None
    per_sample = C * HW * itemsize
    reaching = [nb for nb in feas if nb * per_sample >= target_bytes]
    nb = reaching[0] if reaching else feas[-1]
    # Keep >=2 grid steps when possible so both v7x TensorCores get work
    # (lane density is HW regardless of Nb, so this only costs ~0.35us).
    if N >= 2 and -(-N // nb) < 2:
        multi = [m for m in feas if -(-N // m) >= 2]
        if multi:
            nb = multi[-1]
    # TODO(synk): when N == 1 the fused grid has a single step and one v7x core
    # idles; a fully-parallel HW split would need a cross-core stats combine.
    return nb


def _pick_hw_chunk(HW, C, itemsize, budget):
    """Largest multiple-of-128 pixel chunk whose chunked-path footprint fits
    `budget` (>=128; ragged tails are masked in-kernel)."""
    if HW < 128:
        return HW
    hw_cap = (HW // 128) * 128
    best = 128
    hw = 128
    while hw <= hw_cap and _chunked_step_bytes(C, hw, itemsize) <= budget:
        best = hw
        hw += 128
    return best


# ------------------------------- fused path ----------------------------------


def _gn_fused_kernel(x_ref, p_ref, g_ref, b_ref, o_ref, *, eps, inv_count):
    # x_ref: (Rb, HW) -- Nb whole samples; rows = (sample, channel), lanes = pixels.
    x = x_ref[...].astype(jnp.float32)

    # Pass 1 (in VMEM): per-row sums -> group mean via the same-group indicator
    # matmul (tiny MXU work; MXU is otherwise idle).
    s = jnp.sum(x, axis=1, keepdims=True)                            # (Rb, 1)
    p = p_ref[...]                                                   # (Rb, Rb), resident
    mean = jnp.dot(p, s, preferred_element_type=jnp.float32) * inv_count

    # Pass 2 (in VMEM): centered sum of squares -> group variance.  Avoids
    # E[x^2]-E[x]^2 cancellation; extra pass is slack VPU work (op is HBM-bound).
    xc = x - mean                                                    # (Rb, HW)
    q = jnp.sum(xc * xc, axis=1, keepdims=True)                      # (Rb, 1)
    var = jnp.dot(p, q, preferred_element_type=jnp.float32) * inv_count
    inv = jax.lax.rsqrt(var + eps)                                   # EUP slot

    # y = (x - mean) * (inv * gamma) + beta  : one FMA per element.
    o_ref[...] = (xc * (inv * g_ref[...]) + b_ref[...]).astype(o_ref.dtype)


# -------------------- chunked fallback (very large per-sample) ---------------


def _gn_stats_kernel(x_ref, p_ref, g_ref, b_ref, scale_ref, bias_ref,
                     s_acc, q_acc, *, eps, inv_count, hw_total, hw_chunk, ragged):
    c = pl.program_id(1)

    @pl.when(c == 0)
    def _():
        s_acc[...] = jnp.zeros_like(s_acc)
        q_acc[...] = jnp.zeros_like(q_acc)

    x = x_ref[0].astype(jnp.float32)                                 # (C, hw_chunk)
    if ragged:  # mask lanes past the true row length on the tail chunk
        pos = c * hw_chunk + jax.lax.broadcasted_iota(jnp.int32, x.shape, 1)
        x = jnp.where(pos < hw_total, x, 0.0)
    s_acc[...] += jnp.sum(x, axis=1, keepdims=True)
    q_acc[...] += jnp.sum(x * x, axis=1, keepdims=True)

    @pl.when(c == pl.num_programs(1) - 1)
    def _():
        # Single fused group-spread matmul for both running sums.
        sq = jnp.concatenate([s_acc[...], q_acc[...]], axis=1)            # (C, 2)
        g = jnp.dot(p_ref[...], sq, preferred_element_type=jnp.float32)   # (C, 2)
        mean = g[:, 0:1] * inv_count
        var = g[:, 1:2] * inv_count - mean * mean   # single-pass variance (f32)
        inv = jax.lax.rsqrt(var + eps)
        scale = inv * g_ref[...]
        bias = b_ref[...] - mean * scale
        scale_ref[...] = scale[None]
        bias_ref[...] = bias[None]


def _gn_apply_kernel(x_ref, scale_ref, bias_ref, o_ref):
    x = x_ref[0].astype(jnp.float32)                                 # (C, hw_chunk)
    o_ref[...] = (x * scale_ref[0] + bias_ref[0])[None].astype(o_ref.dtype)


# -------------------------------- wrapper -------------------------------------


def group_norm_block(x, gamma, beta, *, num_groups, eps=1e-5, vmem_budget_bytes=None):
    """GroupNorm forward. x: (N, C, H, W) NCHW; gamma, beta: (C,).

    `vmem_budget_bytes` only overrides the planning budget (fused-vs-chunked
    decision and chunk size); the compiler VMEM limit is device-derived."""
    N, C, H, W = x.shape
    G = num_groups
    assert C % G == 0, "num_channels must be divisible by num_groups"
    Cg = C // G
    HW = H * W
    itemsize = jnp.dtype(x.dtype).itemsize

    limit = _device_vmem_limit_bytes()
    plan = vmem_budget_bytes if vmem_budget_bytes is not None else limit
    budget = int(0.85 * plan)
    inv_count = 1.0 / float(Cg * HW)

    nb = _pick_nb(N, C, HW, itemsize, budget)
    if nb is not None:
        # ---- Fused single-pass-over-HBM path: Nb whole samples per step. ----
        rb = nb * C
        x2 = x.reshape(N * C, HW)
        # Per-row affine params (row = (sample, channel)).
        gamma_t = jnp.tile(gamma.astype(jnp.float32), N).reshape(N * C, 1)
        beta_t = jnp.tile(beta.astype(jnp.float32), N).reshape(N * C, 1)
        # Same-group indicator for one row block; block-position independent
        # because Rb is a multiple of C and groups never span samples.
        gid = jnp.arange(rb) // Cg
        p = (gid[:, None] == gid[None, :]).astype(jnp.float32)        # (Rb, Rb)

        kernel = functools.partial(_gn_fused_kernel, eps=eps, inv_count=inv_count)
        grid = (-(-N // nb),)
        out = pl.pallas_call(
            kernel,
            out_shape=jax.ShapeDtypeStruct((N * C, HW), x.dtype),
            grid_spec=pltpu.PrefetchScalarGridSpec(
                num_scalar_prefetch=0,
                grid=grid,
                in_specs=[
                    pl.BlockSpec((rb, HW), lambda i: (i, 0)),
                    # Constant block index => fetched once, stays resident.
                    pl.BlockSpec((rb, rb), lambda i: (0, 0)),
                    pl.BlockSpec((rb, 1), lambda i: (i, 0)),
                    pl.BlockSpec((rb, 1), lambda i: (i, 0)),
                ],
                out_specs=pl.BlockSpec((rb, HW), lambda i: (i, 0)),
            ),
            compiler_params=pltpu.CompilerParams(
                dimension_semantics=("parallel",),
                vmem_limit_bytes=limit,
            ),
        )(x2, p, gamma_t, beta_t)
        return out.reshape(N, C, H, W)

    # ---- Chunked two-pass fallback: per-sample working set too large. ----
    x_r = x.reshape(N, C, HW)
    gamma_r = gamma.reshape(C, 1).astype(jnp.float32)
    beta_r = beta.reshape(C, 1).astype(jnp.float32)
    grp = jnp.arange(C) // Cg
    p = (grp[:, None] == grp[None, :]).astype(jnp.float32)            # (C, C)

    hw_chunk = _pick_hw_chunk(HW, C, itemsize, budget)
    n_chunks = -(-HW // hw_chunk)
    ragged = (HW % hw_chunk) != 0

    stats = functools.partial(_gn_stats_kernel, eps=eps, inv_count=inv_count,
                              hw_total=HW, hw_chunk=hw_chunk, ragged=ragged)
    scale, bias = pl.pallas_call(
        stats,
        out_shape=(jax.ShapeDtypeStruct((N, C, 1), jnp.float32),
                   jax.ShapeDtypeStruct((N, C, 1), jnp.float32)),
        grid_spec=pltpu.PrefetchScalarGridSpec(
            num_scalar_prefetch=0,
            grid=(N, n_chunks),
            in_specs=[
                pl.BlockSpec((1, C, hw_chunk), lambda n, c: (n, 0, c)),
                pl.BlockSpec((C, C), lambda n, c: (0, 0)),
                pl.BlockSpec((C, 1), lambda n, c: (0, 0)),
                pl.BlockSpec((C, 1), lambda n, c: (0, 0)),
            ],
            out_specs=[
                pl.BlockSpec((1, C, 1), lambda n, c: (n, 0, 0)),
                pl.BlockSpec((1, C, 1), lambda n, c: (n, 0, 0)),
            ],
            scratch_shapes=[pltpu.VMEM((C, 1), jnp.float32),
                            pltpu.VMEM((C, 1), jnp.float32)],
        ),
        compiler_params=pltpu.CompilerParams(
            dimension_semantics=("parallel", "arbitrary"),
            vmem_limit_bytes=limit,
        ),
    )(x_r, p, gamma_r, beta_r)

    out = pl.pallas_call(
        _gn_apply_kernel,
        out_shape=jax.ShapeDtypeStruct((N, C, HW), x.dtype),
        grid_spec=pltpu.PrefetchScalarGridSpec(
            num_scalar_prefetch=0,
            grid=(N, n_chunks),
            in_specs=[
                pl.BlockSpec((1, C, hw_chunk), lambda n, c: (n, 0, c)),
                pl.BlockSpec((1, C, 1), lambda n, c: (n, 0, 0)),
                pl.BlockSpec((1, C, 1), lambda n, c: (n, 0, 0)),
            ],
            out_specs=pl.BlockSpec((1, C, hw_chunk), lambda n, c: (n, 0, c)),
        ),
        compiler_params=pltpu.CompilerParams(
            dimension_semantics=("parallel", "parallel"),
            vmem_limit_bytes=limit,
        ),
    )(x_r, scale, bias)
    return out.reshape(N, C, H, W)


# -------------------------------- reference -----------------------------------


def _group_norm_ref(x, gamma, beta, *, num_groups, eps=1e-5):
    N, C, H, W = x.shape
    Cg = C // num_groups
    xr = x.reshape(N, num_groups, Cg * H * W).astype(jnp.float32)
    mean = xr.mean(axis=-1, keepdims=True)
    var = ((xr - mean) ** 2).mean(axis=-1, keepdims=True)
    xn = ((xr - mean) / jnp.sqrt(var + eps)).reshape(N, C, H, W)
    return (xn * gamma[None, :, None, None] + beta[None, :, None, None]).astype(x.dtype)


if __name__ == "__main__":
    # Mirrors GroupNormBlock(args, num_channels) with args.n_divs = 4
    # (n_divs != 1 => num_groups = n_divs), args.bnArgs['eps'] = 1e-5.
    num_groups = 4
    num_channels = 8
    eps = 1e-5

    key = jax.random.PRNGKey(0)
    kx, kg, kb, kx2 = jax.random.split(key, 4)
    gamma = 1.0 + 0.1 * jax.random.normal(kg, (num_channels,), dtype=jnp.float32)
    beta = 0.1 * jax.random.normal(kb, (num_channels,), dtype=jnp.float32)

    # --- Test 1: fused path (samples batched per grid step, >=2 steps). ---
    N, C, H, W = 2, num_channels, 16, 16
    x = jax.random.normal(kx, (N, C, H, W), dtype=jnp.float32)
    y = jax.block_until_ready(
        group_norm_block(x, gamma, beta, num_groups=num_groups, eps=eps))
    y_ref = _group_norm_ref(x, gamma, beta, num_groups=num_groups, eps=eps)
    assert y.shape == (N, C, H, W)
    assert jnp.max(jnp.abs(y - y_ref)) < 1e-4, "fused path mismatch vs reference"

    # --- Test 2: chunked fallback with ragged tail chunk (forced tiny budget). ---
    N2, C2, H2, W2 = 2, num_channels, 16, 64
    x2 = jax.random.normal(kx2, (N2, C2, H2, W2), dtype=jnp.float32)
    y2 = jax.block_until_ready(
        group_norm_block(x2, gamma, beta, num_groups=num_groups, eps=eps,
                         vmem_budget_bytes=192 * 1024))
    y2_ref = _group_norm_ref(x2, gamma, beta, num_groups=num_groups, eps=eps)
    assert jnp.max(jnp.abs(y2 - y2_ref)) < 1e-4, "chunked path mismatch vs reference"

    print("KERNEL_OK")
</pallas_src>

<mosaic_0001>
module attributes {stable_mosaic.version = 11 : i64} {
  func.func @_gn_fused_kernel(%arg0: i32, %arg1: memref<8x256xf32, #tpu.memory_space<vmem>>, %arg2: memref<8x8xf32, #tpu.memory_space<vmem>>, %arg3: memref<8x1xf32, #tpu.memory_space<vmem>>, %arg4: memref<8x1xf32, #tpu.memory_space<vmem>>, %arg5: memref<8x256xf32, #tpu.memory_space<vmem>>) attributes {dimension_semantics = [#tpu.dimension_semantics<parallel>], iteration_bounds = array<i64: 2>, scalar_prefetch = 0 : i64, scratch_operands = 0 : i64, tpu.core_type = #tpu.core_type<tc>, window_params = [{transform_indices = @transform_0, window_bounds = array<i64: 8, 256>}, {pipeline_mode = #tpu.pipeline_mode<synchronous>, transform_indices = @transform_1, window_bounds = array<i64: 8, 8>}, {transform_indices = @transform_2, window_bounds = array<i64: 8, 1>}, {transform_indices = @transform_3, window_bounds = array<i64: 8, 1>}, {transform_indices = @transform_4, window_bounds = array<i64: 8, 256>}]} {
    %c0 = arith.constant 0 : index
    %c0_0 = arith.constant 0 : index
    %0 = vector.load %arg1[%c0, %c0_0] : memref<8x256xf32, #tpu.memory_space<vmem>>, vector<8x256xf32>
    %cst = arith.constant dense<0.000000e+00> : vector<8xf32>
    %1 = vector.multi_reduction <add>, %0, %cst [1] : vector<8x256xf32> to vector<8xf32>
    %2 = vector.shape_cast %1 : vector<8xf32> to vector<8x1xf32>
    %c0_1 = arith.constant 0 : index
    %c0_2 = arith.constant 0 : index
    %3 = vector.load %arg2[%c0_1, %c0_2] : memref<8x8xf32, #tpu.memory_space<vmem>>, vector<8x8xf32>
    %cst_3 = arith.constant dense<0.000000e+00> : vector<8x1xf32>
    %4 = tpu.matmul %3, %2, %cst_3 {dimension_numbers = #tpu.dot_dimension_numbers<[1], [0], [0], [1], [0, 0, 1, 1], [], []>} : vector<8x8xf32>, vector<8x1xf32>, vector<8x1xf32> -> vector<8x1xf32>
    %cst_4 = arith.constant 0.001953125 : f32
    %5 = vector.broadcast %cst_4 : f32 to vector<8x1xf32>
    %6 = arith.mulf %4, %5 : vector<8x1xf32>
    %7 = vector.broadcast %6 : vector<8x1xf32> to vector<8x256xf32>
    %8 = arith.subf %0, %7 : vector<8x256xf32>
    %9 = arith.mulf %8, %8 : vector<8x256xf32>
    %cst_5 = arith.constant dense<0.000000e+00> : vector<8xf32>
    %10 = vector.multi_reduction <add>, %9, %cst_5 [1] : vector<8x256xf32> to vector<8xf32>
    %11 = vector.shape_cast %10 : vector<8xf32> to vector<8x1xf32>
    %cst_6 = arith.constant dense<0.000000e+00> : vector<8x1xf32>
    %12 = tpu.matmul %3, %11, %cst_6 {dimension_numbers = #tpu.dot_dimension_numbers<[1], [0], [0], [1], [0, 0, 1, 1], [], []>} : vector<8x8xf32>, vector<8x1xf32>, vector<8x1xf32> -> vector<8x1xf32>
    %cst_7 = arith.constant 0.001953125 : f32
    %13 = vector.broadcast %cst_7 : f32 to vector<8x1xf32>
    %14 = arith.mulf %12, %13 : vector<8x1xf32>
    %cst_8 = arith.constant 9.99999974E-6 : f32
    %15 = vector.broadcast %cst_8 : f32 to vector<8x1xf32>
    %16 = arith.addf %14, %15 : vector<8x1xf32>
    %17 = math.rsqrt %16 : vector<8x1xf32>
    %c0_9 = arith.constant 0 : index
    %c0_10 = arith.constant 0 : index
    %18 = vector.load %arg3[%c0_9, %c0_10] : memref<8x1xf32, #tpu.memory_space<vmem>>, vector<8x1xf32>
    %19 = arith.mulf %17, %18 : vector<8x1xf32>
    %20 = vector.broadcast %19 : vector<8x1xf32> to vector<8x256xf32>
    %21 = arith.mulf %8, %20 : vector<8x256xf32>
    %c0_11 = arith.constant 0 : index
    %c0_12 = arith.constant 0 : index
    %22 = vector.load %arg4[%c0_11, %c0_12] : memref<8x1xf32, #tpu.memory_space<vmem>>, vector<8x1xf32>
    %23 = vector.broadcast %22 : vector<8x1xf32> to vector<8x256xf32>
    %24 = arith.addf %21, %23 : vector<8x256xf32>
    %c0_13 = arith.constant 0 : index
    %c0_14 = arith.constant 0 : index
    %25 = vector.load %arg5[%c0_13, %c0_14] : memref<8x256xf32, #tpu.memory_space<vmem>>, vector<8x256xf32>
    tpu.vector_store %arg5[%c0_13, %c0_14], %24 {strides = array<i32>} : memref<8x256xf32, #tpu.memory_space<vmem>>, vector<8x256xf32>,
    return
  }
  func.func @transform_0(%arg0: i32) -> (i32, i32) {
    %c0_i32 = arith.constant 0 : i32
    %c0_i32_0 = arith.constant 0 : i32
    return %arg0, %c0_i32 : i32, i32
  }
  func.func @transform_1(%arg0: i32) -> (i32, i32) {
    %c0_i32 = arith.constant 0 : i32
    %c0_i32_0 = arith.constant 0 : i32
    %c0_i32_1 = arith.constant 0 : i32
    return %c0_i32, %c0_i32_0 : i32, i32
  }
  func.func @transform_2(%arg0: i32) -> (i32, i32) {
    %c0_i32 = arith.constant 0 : i32
    %c0_i32_0 = arith.constant 0 : i32
    return %arg0, %c0_i32 : i32, i32
  }
  func.func @transform_3(%arg0: i32) -> (i32, i32) {
    %c0_i32 = arith.constant 0 : i32
    %c0_i32_0 = arith.constant 0 : i32
    return %arg0, %c0_i32 : i32, i32
  }
  func.func @transform_4(%arg0: i32) -> (i32, i32) {
    %c0_i32 = arith.constant 0 : i32
    %c0_i32_0 = arith.constant 0 : i32
    return %arg0, %c0_i32 : i32, i32
  }
}

</mosaic_0001>

<bundles_post_ra>
// kernel: tpu_custom_call.1
= control target key start
LH: loop header
LB: loop body
LE: loop exit
PB: predicated region body
PF: predicated region fallthrough
CT: control target
= control target key end

     0   :  { %9 = vsyncpa [#allocation3], 0  ;;  %s902_s0 = inlined_call_operand.vmem [shape: f32[16,256], index: 0, kind: input, shape index: {}]   ;;  %s903_s1 = inlined_call_operand.hbm [shape: f32[8,8], index: 1, kind: input, shape index: {}]   ;;  %s904_s2 = inlined_call_operand.vmem [shape: f32[16,1], index: 2, kind: input, shape index: {}]   ;;  %s905_s3 = inlined_call_operand.vmem [shape: f32[16,1], index: 3, kind: input, shape index: {}]   ;;  %s906_s4 = inlined_call_operand.hbm [shape: f32[16,256], index: 4, kind: output, shape index: {}]  }
   0x1   :  { %10 = vsyncpa [#allocation4], 0 }
   0x2   :  { %12 = vsyncpa [#allocation4 + $0x1], 0  ;;  %s755_s15 = smov 0   ;;  %s757_s16 = smov 0  }
   0x3   :  { %s759_s17 = smov 0   ;;  %s761_s18 = smov 0  }
   0x4 LB: > { %s776_s19 = sadd.s32 4294967295, %s723_s18   ;;  %s538_s20 = sadd.s32 4294967294, %s723_s18   ;;  %s723_s18 = sphi %s761_s18, %s922_s18   ;;  %s719_s17 = sphi %s759_s17, %s921_s17   ;;  %s715_s16 = sphi %s757_s16, %s920_s16   ;;  %s711_s15 = sphi %s755_s15, %s919_s15  }
   0x5   : > { %s780_s21 = sadd.s32 1, %s723_s18   ;;  %s124_s22 = sadd.s32 1, %s719_s17 }
   0x6   : > { %s121_s23 = ssub.s32 %s723_s18, %s780_s21  ;;  %p134_p0 = scmp.ne.s32.totalorder %s719_s17, %s715_s16 }
   0x7   : > { %p122_p1 = scmp.eq.s32.totalorder %s121_s23, 0  ;;  %p135_p2 = scmp.eq.s32.totalorder %s776_s19, 1 }
   0x8   : > { %p140_p3 = scmp.ne.s32.totalorder %s715_s16, %s711_s15  ;;  %p141_p4 = scmp.eq.s32.totalorder %s538_s20, 1 }
   0x9   : > { %s791_s24 = scalar_select %p122_p1, %s719_s17, %s124_s22  }
   0xa   : > { %p793_p5 = por %p135_p2, %p134_p0  ;;  %p797_p6 = por %p141_p4, %p140_p3 }
   0xb   : > { %p539_p7 = scmp.ge.s32.totalorder %s723_s18, 1  ;;  %p148_p8 = scmp.lt.s32.totalorder %s723_s18, 3 }
   0xc   : > { %s910_s25 = scalar_select %p793_p5, 1, 0 }
   0xd   : > { %s911_s26 = scalar_select %p797_p6, 1, 0 }
   0xe   : > { %p907_p9 = scmp.eq.s32.totalorder %s776_s19, 0  ;;  %p804_p10 = pnand %p539_p7, %p148_p8 }
   0xf   : > { %s725_s28 = smov [#allocation2]   ;;  %s629_s7 = scalar_lea.hbm %s903_s1, 128 }
  0x10   : > { %s912_s27 = scalar_select %p804_p10, 1, 0 }
  0x11   : > { %s161_s29 = sshll.u32 %s725_s28, 4  ;;  %p578_p11 = pneg %p804_p10  ;;  %s162_s29 = int_to_ptr.vmem [resolvable:$true] %s161_s29 }
  0x12   : > { %p630_p13 = scmp.ne.s32.totalorder %s903_s1, %s629_s7  ;;  %p636_p3 = scmp.lt.u32.totalorder %s629_s7, %s903_s1 }
  0x13   : > { %p812_p12 = pnand %p907_p9, %p578_p11 }
  0x15   : > { %p631_p0 = pneg %p812_p12 }
  0x17   : > { %p632_p1 = pnand %p631_p0, %p630_p13 }
  0x19   : > { %p633_p2 = pneg %p632_p1 }
  0x1b   : > { %p638_p4 = pnand %p636_p3, %p633_p2 }
  0x1d   : > { %641 = shalt.err (!%p638_p4)
}
  0x1e   : > { %s642_s12 = scalar_lea.vmem %s162_s29, 128  ;;  %p650_p9 = scmp.lt.s32.totalorder %s162_s29, %s162_s29 }
  0x1f   : > { %p643_p7 = scmp.ne.s32.totalorder %s162_s29, %s642_s12  ;;  %p651_p6 = scmp.lt.s32.totalorder %s642_s12, %s642_s12 }
  0x21   : > { %p645_p8 = pnand %p643_p7, %p631_p0  ;;  %p652_p5 = por %p651_p6, %p650_p9 }
  0x23   : > { %p646_p11 = pneg %p645_p8 }
  0x25   : > { %p653_p10 = pnand %p652_p5, %p646_p11 }
  0x27   : > { %656 = shalt.err (!%p653_p10)
}
  0x28   : > { %581 = dma.hbm_to_vmem [thread:$0]  (!%p812_p12), %s903_s1, 128, %s162_s29, [#allocation3]  }
  0x29   : > { %p914_p13 = scmp.ne.s32.totalorder %s912_s27, 0 }
  0x2a   : > { %p915_p1 = scmp.eq.s32.totalorder (!%p914_p13), %s776_s19, 0 }
  0x2b   : > { %196 = sbr.rel (%p914_p13) target bundleno = 1071 (0x42f), region = 36 }
  0x32   : > { %702 = dma.done.wait (%p915_p1), [#allocation3], 128   ;;  %p916_p0 = pmov %p915_p1 }
  0x33   : > { %p230_p6 = scmp.lt.s32.totalorder %s776_s19, 1  ;;  %v726_v0 = vmov 0.0   ;;  %vm727_vm0 = vmmov 0   ;;  %v248_v4 = vld [vmem:[#allocation2] sm:$0xff]  ;;  %vm249_vm1 = vcmask 64512   ;;  %v728_v6 = vmov 0  }
  0x34   : > { %704 = vsyncadd (%p916_p0), [#allocation3], 4294967168  ;;  %562 = vmatprep.subr.mxu0 %v726_v0  ;;  %567 = vmatprep.subr.mxu1 %v726_v0  ;;  %s227_s10 = sand.u32 1, %s715_s16   ;;  %s557_s12 = sshll.u32 %s776_s19, 8 }
  0x35   : > { %s840_s20 = scalar_select %p230_p6, %s776_s19, 1  ;;  %564 = vmatprep.mubr.msk.f32.mxu0 %vm727_vm0, %v726_v0  ;;  %569 = vmatprep.mubr.msk.f32.mxu1 %vm727_vm0, %v726_v0 }
  0x36   : > { %625 = vset.pattern.permute.xlu0 %v728_v6  ;;  %626 = vset.pattern.permute.xlu1 %v728_v6  ;;  %s544_s11 = sshll.u32 %s227_s10, 4  ;;  %s860_s23 = scalar_lea.hbm %s906_s4, %s557_s12 }
  0x37   : > { %s556_s22 = sshll.u32 %s840_s20, 4  ;;  %s547_s29 = sshll.u32 %s840_s20, 3 }
  0x38   : > { %s234_s27 = scalar_lea.vmem %s902_s0, %s556_s22  ;;  %s238_s6 = scalar_lea.vmem %s904_s2, %s547_s29 }
  0x39   : > { %v243_v1 = vld [vmem:[%s234_s27] sm:$0xff]  ;;  %v244_v2 = vld [vmem:[%s234_s27 + $0x8] sm:$0xff]  ;;  %s242_s9 = scalar_lea.vmem %s905_s3, %s547_s29  ;;  %s229_s13 = scalar_lea.vmem [#allocation5], %s544_s11 }
  0x3a   : > { %v245_v3 = vadd.f32 %v244_v2, %v243_v1  ;;  %v409_v21 = vld [vmem:[%s238_s6] sm:$0xff]  ;;  %s443_s14 = sshll.u32 %s229_s13, 4  ;;  %s429_s19 = scalar_lea.sflag [#allocation4], %s227_s10  ;;  %s862_s14 = int_to_ptr.vmem [resolvable:$true] %s443_s14 }
  0x3b   : > { %v418_v24 = vld [vmem:[%s242_s9] sm:$0xff]  ;;  %s657_s28 = scalar_lea.vmem %s862_s14, 256  ;;  %p917_p9 = scmp.ne.s32.totalorder %s910_s25, 0 }
  0x3c   : > { %246 = vadd.xlane.f32.xlu0 %v245_v3  ;;  %p658_p5 = scmp.ne.s32.totalorder %s862_s14, %s657_s28  ;;  %s729_s27 = smov [#allocation5]  }
  0x3d   : > { %s661_s29 = sshll.u32 %s729_s27, 4  ;;  %s662_s29 = int_to_ptr.vmem [resolvable:$false] %s661_s29 }
  0x3e   : > { %p659_p10 = pnand %p658_p5, %p917_p9  ;;  %s663_s30 = scalar_lea.vmem %s662_s29, 512 }
  0x3f   : > { %p664_p2 = scmp.lt.s32.totalorder %s862_s14, %s662_s29  ;;  %p665_p3 = scmp.lt.s32.totalorder %s663_s30, %s657_s28 }
  0x40   : > { %p660_p12 = pneg %p659_p10 }
  0x41   : > { %p666_p4 = por %p665_p3, %p664_p2 }
  0x43   : > { %p667_p7 = pnand %p666_p4, %p660_p12 }
  0xc9   : > { %v247_v5 = vpop.xlane.xlu0 %246 }
  0xca   : > { %563 = vmatpush3.msra.mxu0 %v247_v5 }
  0xcb   : > { %565 = vmatmul.mubr.msk.f32.vlgmr.msra.gmra.mrb[0].mxu0 %vm249_vm1, %v248_v4 }
 0x19e   : > { %v319_v7 = vpop.f32.mrb[0].mxu0 }
 0x19f   : > { %v323_v8 = vmul.f32 0.001953125, %v319_v7  ;;  %v566_v9 = vpop.f32.mrb[1].mxu0 }
 0x1a1   : > { %326 = vperm.xlu0 %625, %v323_v8  }
 0x220   : > { %v327_v10 = vpop.permute.xlu0 %326 }
 0x221   : > { %v329_v11 = vsub.f32 %v243_v1, %v327_v10  ;;  %v330_v12 = vsub.f32 %v244_v2, %v327_v10 }
 0x223   : > { %v331_v13 = vmul.f32 %v329_v11, %v329_v11  ;;  %v332_v14 = vmul.f32 %v330_v12, %v330_v12 }
 0x225   : > { %v333_v15 = vadd.f32 %v332_v14, %v331_v13 }
 0x227   : > { %334 = vadd.xlane.f32.xlu1 %v333_v15 }
 0x2b4   : > { %v335_v16 = vpop.xlane.xlu1 %334 }
 0x2b5   : > { %568 = vmatpush3.msra.mxu1 %v335_v16 }
 0x2b6   : > { %570 = vmatmul.mubr.msk.f32.vlgmr.msra.gmra.mrb[0].mxu1 %vm249_vm1, %v248_v4 }
 0x389   : > { %v402_v17 = vpop.f32.mrb[0].mxu1 }
 0x38a   : > { %v406_v18 = vmul.f32 0.001953125, %v402_v17  ;;  %v571_v19 = vpop.f32.mrb[1].mxu1 }
 0x38c   : > { %v407_v20 = vadd.f32 1e-05, %v406_v18 }
 0x38e   : > { %627 = vrsqrt.f32 %v407_v20 }
 0x398   : > { %v628_v22 = vpop.eup %627 }
 0x399   : > { %v410_v23 = vmul.f32 %v628_v22, %v409_v21 }
 0x39b   : > { %413 = vperm.xlu1 %626, %v410_v23  }
 0x39f   : > { %421 = vperm.xlu1 %626, %v418_v24  }
 0x41a   : > { %v414_v25 = vpop.permute.xlu1 %413 }
 0x41b   : > { %v416_v26 = vmul.f32 %v414_v25, %v329_v11  ;;  %v417_v27 = vmul.f32 %v414_v25, %v330_v12 }
 0x41e   : > { %v422_v28 = vpop.permute.xlu1 %421 }
 0x41f   : > { %v424_v29 = vadd.f32 %v422_v28, %v416_v26  ;;  %v425_v30 = vadd.f32 %v422_v28, %v417_v27 }
 0x421   : > { %426 = vst [vmem:[%s229_s13] sm:$0xff] %v424_v29  ;;  %427 = vst [vmem:[%s229_s13 + $0x8] sm:$0xff] %v425_v30 }
 0x422   : > { %670 = shalt.err (!%p667_p7)
}
 0x423   : > { %s671_s5 = scalar_lea.hbm %s860_s23, 256  ;;  %s675_s8 = scalar_lea.hbm %s906_s4, 512 }
 0x424   : > { %p672_p8 = scmp.ne.s32.totalorder %s860_s23, %s671_s5  ;;  %p676_p1 = scmp.lt.u32.totalorder %s860_s23, %s906_s4 }
 0x425   : > { %p677_p0 = scmp.lt.u32.totalorder %s675_s8, %s671_s5  ;;  %p679_p5 = scmp.lt.u32.totalorder %s671_s5, %s860_s23 }
 0x426   : > { %p673_p11 = pnand %p672_p8, %p917_p9 }
 0x427   : > { %p678_p6 = por %p677_p0, %p676_p1 }
 0x428   : > { %p674_p13 = pneg %p673_p11 }
 0x429   : > { %p680_p10 = por %p679_p5, %p678_p6 }
 0x42b   : > { %p681_p12 = pnand %p680_p10, %p674_p13 }
 0x42d   : > { %684 = shalt.err (!%p681_p12)
}
 0x42e   : > { %576 = dma.vmem_to_hbm [thread:$0]  (%p917_p9), %s862_s14, 256, %s860_s23, %s429_s19  }
 0x42f PF: > { %p588_p2 = scmp.ge.s32.totalorder %s723_s18, 2  ;;  %s455_s11 = sand.u32 1, %s711_s15  }
 0x430   : > { %p918_p3 = scmp.ne.s32.totalorder %s911_s26, 0  ;;  %s456_s12 = scalar_lea.sflag [#allocation4], %s455_s11 }
 0x432   : > { %p583_p4 = pnand %p588_p2, %p918_p3 }
 0x434   : > { %706 = dma.done.wait (!%p583_p4), %s456_s12, 256  }
 0x435   : > { %708 = vsyncadd (!%p583_p4), %s456_s12, 4294967040  ;;  %p15_p7 = scmp.ge.s32.totalorder %s780_s21, 4   ;;  %s919_s15 = smov %s715_s16 }
 0x436   : > { %s920_s16 = smov %s719_s17  ;;  %s921_s17 = smov %s791_s24 }
 0x437   : > { %s922_s18 = smov %s780_s21  ;;  %17 = sbr.rel (!%p15_p7) target bundleno = 4 (0x4), region = 82 }
 0x43e   :  { %461 = vsyncpa [#allocation3], 1 }
 0x43f   :  { %463 = vsyncpa [#allocation3 + $0x1], 1 }
 0x440   :  { %464 = vsyncpa [#allocation4], 1 }
 0x441   :  { %466 = vsyncpa [#allocation4 + $0x1], 1 }

</bundles_post_ra>
